<compile_context>
chip_gen: v5e
topology: v5e:2x2
jax: 0.10.0
libtpu: 0.0.40
codegen_flags: <defaults>
</compile_context>

<pallas_src>
import math

import jax
import jax.numpy as jnp
from jax.experimental import pallas as pl
from jax.experimental.pallas import tpu as pltpu


L_PAD = 128  # latent dim padded to one full 128-lane vector register


# ---------------------------------------------------------------------------
# Fused Pallas kernel: enc1 -> enc2 -> (mean|log_var) -> reparam -> dec1 -> dec2
# ---------------------------------------------------------------------------

def _vae_fused_kernel(x_ref, eps_ref,
                      w1_ref, b1_ref, w2_ref, b2_ref,
                      wh_ref, bh_ref, w3_ref, b3_ref, w4_ref, b4_ref,
                      xhat_ref, mean_ref, logvar_ref, z_ref):
    """Whole VAE forward for one batch tile; weights stay resident in VMEM."""
    f32 = jnp.float32
    bf16 = jnp.bfloat16

    # ---- encoder MLP (bf16 operands, f32 accumulation) ----
    h = jnp.dot(x_ref[...], w1_ref[...], preferred_element_type=f32) + b1_ref[...]
    h = jnp.maximum(h, 0.0)
    h = jnp.dot(h.astype(bf16), w2_ref[...], preferred_element_type=f32) + b2_ref[...]
    h = jnp.maximum(h, 0.0)

    # ---- fused mean / log_var heads: one wide matmul, slice at 128-lane boundary ----
    hv = jnp.dot(h.astype(bf16), wh_ref[...], preferred_element_type=f32) + bh_ref[...]
    mean = hv[:, :L_PAD]
    log_var = hv[:, L_PAD:]

    # ---- reparameterization: z = exp(0.5*log_var) * eps + mean ----
    std = jnp.exp(0.5 * log_var)
    z = std * eps_ref[...] + mean        # padded lanes: eps==0, mean==0 -> z==0

    # ---- decoder MLP ----
    d = jnp.dot(z.astype(bf16), w3_ref[...], preferred_element_type=f32) + b3_ref[...]
    d = jnp.maximum(d, 0.0)
    xh = jnp.dot(d.astype(bf16), w4_ref[...], preferred_element_type=f32) + b4_ref[...]
    xh = jax.nn.sigmoid(xh)

    # ---- lane-dense stores ----
    xhat_ref[...] = xh
    mean_ref[...] = mean
    logvar_ref[...] = log_var
    z_ref[...] = z


# ---------------------------------------------------------------------------
# Parameter init (deterministic, mimicking nn.Linear default U(-1/sqrt(in), .))
# ---------------------------------------------------------------------------

def init_linear(key, in_f, out_f):
    kw, kb = jax.random.split(key)
    bound = 1.0 / math.sqrt(in_f)
    w = jax.random.uniform(kw, (in_f, out_f), jnp.float32, -bound, bound)
    b = jax.random.uniform(kb, (1, out_f), jnp.float32, -bound, bound)
    return w, b


def init_vae_params(key, in_features, hidden, out_features, latent_dim):
    ks = jax.random.split(key, 6)
    return {
        # encoder MLP stand-in: in_features -> hidden -> out_features
        "enc1": init_linear(ks[0], in_features, hidden),
        "enc2": init_linear(ks[1], hidden, out_features),
        # VAE heads
        "mean": init_linear(ks[2], out_features, latent_dim),
        "var": init_linear(ks[3], out_features, latent_dim),
        # decoder MLP stand-in: latent_dim -> out_features -> in_features
        "dec1": init_linear(ks[4], latent_dim, out_features),
        "dec2": init_linear(ks[5], out_features, in_features),
    }


# ---------------------------------------------------------------------------
# Forward wrapper (packing / padding is layout plumbing, hot path is the kernel)
# ---------------------------------------------------------------------------

def _round_up(n, m):
    return ((n + m - 1) // m) * m


def vae_forward(params, x, eps):
    B, in_features = x.shape
    w1, b1 = params["enc1"]
    w2, b2 = params["enc2"]
    wm, bmean = params["mean"]
    wv, bvar = params["var"]
    w3, b3 = params["dec1"]
    w4, b4 = params["dec2"]
    hidden = w1.shape[1]
    out_features = w2.shape[1]
    latent = wm.shape[1]
    assert latent <= L_PAD

    # Pack + lane-pad the latent-facing weights so every matmul is 128-lane dense.
    wh = jnp.zeros((out_features, 2 * L_PAD), jnp.float32)
    wh = wh.at[:, :latent].set(wm).at[:, L_PAD:L_PAD + latent].set(wv)
    bh = jnp.zeros((1, 2 * L_PAD), jnp.float32)
    bh = bh.at[:, :latent].set(bmean).at[:, L_PAD:L_PAD + latent].set(bvar)
    w3p = jnp.zeros((L_PAD, out_features), jnp.float32).at[:latent].set(w3)

    # bf16 operands (f32 accumulation happens in the kernel); biases stay f32.
    bf = jnp.bfloat16
    w1b, w2b, whb, w3b, w4b = (w.astype(bf) for w in (w1, w2, wh, w3p, w4))

    # Batch tile: whole (padded) batch when small, 128 rows otherwise.
    B_pad = _round_up(B, 8)
    if B_pad <= 256:
        bm_tile = B_pad
    else:
        bm_tile = 128
        B_pad = _round_up(B, bm_tile)

    xp = jnp.zeros((B_pad, in_features), bf).at[:B].set(x.astype(bf))
    epsp = jnp.zeros((B_pad, L_PAD), jnp.float32).at[:B, :latent].set(eps)

    const = lambda i: (0, 0)
    row = lambda i: (i, 0)

    out_shapes = (
        jax.ShapeDtypeStruct((B_pad, in_features), jnp.float32),  # x_hat
        jax.ShapeDtypeStruct((B_pad, L_PAD), jnp.float32),        # mean   (lane-padded)
        jax.ShapeDtypeStruct((B_pad, L_PAD), jnp.float32),        # log_var(lane-padded)
        jax.ShapeDtypeStruct((B_pad, L_PAD), jnp.float32),        # z      (lane-padded)
    )

    x_hat, mean, log_var, z = pl.pallas_call(
        _vae_fused_kernel,
        out_shape=out_shapes,
        grid=(B_pad // bm_tile,),
        in_specs=[
            pl.BlockSpec((bm_tile, in_features), row),      # x
            pl.BlockSpec((bm_tile, L_PAD), row),            # eps
            pl.BlockSpec((in_features, hidden), const),     # enc1 W
            pl.BlockSpec((1, hidden), const),               # enc1 b
            pl.BlockSpec((hidden, out_features), const),    # enc2 W
            pl.BlockSpec((1, out_features), const),         # enc2 b
            pl.BlockSpec((out_features, 2 * L_PAD), const), # [mean|var] W (padded)
            pl.BlockSpec((1, 2 * L_PAD), const),            # [mean|var] b (padded)
            pl.BlockSpec((L_PAD, out_features), const),     # dec1 W (row-padded)
            pl.BlockSpec((1, out_features), const),         # dec1 b
            pl.BlockSpec((out_features, in_features), const),  # dec2 W
            pl.BlockSpec((1, in_features), const),          # dec2 b
        ],
        out_specs=(
            pl.BlockSpec((bm_tile, in_features), row),
            pl.BlockSpec((bm_tile, L_PAD), row),
            pl.BlockSpec((bm_tile, L_PAD), row),
            pl.BlockSpec((bm_tile, L_PAD), row),
        ),
        compiler_params=pltpu.CompilerParams(dimension_semantics=("parallel",)),
    )(xp, epsp, w1b, b1, w2b, b2, whb, bh, w3b, b3, w4b, b4)

    return (x_hat[:B], mean[:B, :latent], log_var[:B, :latent], z[:B, :latent])


# ---------------------------------------------------------------------------
# Pure-JAX reference (same bf16-operand / f32-accumulation semantics)
# ---------------------------------------------------------------------------

def vae_forward_ref(params, x, eps):
    bf = jnp.bfloat16

    def lin(h, wb, act=None):
        w, b = wb
        y = jnp.dot(h.astype(bf), w.astype(bf),
                    preferred_element_type=jnp.float32) + b
        if act == "relu":
            y = jnp.maximum(y, 0.0)
        elif act == "sigmoid":
            y = jax.nn.sigmoid(y)
        return y

    h = lin(lin(x, params["enc1"], "relu"), params["enc2"], "relu")
    mean = lin(h, params["mean"])
    log_var = lin(h, params["var"])
    z = jnp.exp(0.5 * log_var) * eps + mean
    x_hat = lin(lin(z, params["dec1"], "relu"), params["dec2"], "sigmoid")
    return x_hat, mean, log_var, z


# ---------------------------------------------------------------------------

if __name__ == "__main__":
    B = 8               # batch
    IN_FEATURES = 256   # flattened input size fed to the encoder
    HIDDEN = 128
    OUT_FEATURES = 128  # encoder output width (== Linear in_features of heads)
    LATENT = 32

    key = jax.random.PRNGKey(0)
    k_x, k_eps, k_params = jax.random.split(key, 3)

    x = jax.random.normal(k_x, (B, IN_FEATURES), jnp.float32)
    # epsilon ~ N(0, 1), drawn deterministically (stands in for torch.randn_like)
    eps = jax.random.normal(k_eps, (B, LATENT), jnp.float32)
    params = init_vae_params(k_params, IN_FEATURES, HIDDEN, OUT_FEATURES, LATENT)

    outs = jax.jit(vae_forward)(params, x, eps)
    outs = jax.block_until_ready(outs)

    refs = vae_forward_ref(params, x, eps)
    for name, o, r in zip(["x_hat", "mean", "log_var", "z"], outs, refs):
        assert o.shape == r.shape and o.dtype == r.dtype, f"{name} shape/dtype"
        assert jnp.allclose(o, r, atol=1e-2, rtol=1e-2), f"{name} mismatch vs reference"

    print("KERNEL_OK")
</pallas_src>

<mosaic_0001>
module attributes {stable_mosaic.version = 11 : i64} {
  func.func @_vae_fused_kernel(%arg0: i32, %arg1: memref<8x256xbf16, #tpu.memory_space<vmem>>, %arg2: memref<8x128xf32, #tpu.memory_space<vmem>>, %arg3: memref<256x128xbf16, #tpu.memory_space<vmem>>, %arg4: memref<1x128xf32, #tpu.memory_space<vmem>>, %arg5: memref<128x128xbf16, #tpu.memory_space<vmem>>, %arg6: memref<1x128xf32, #tpu.memory_space<vmem>>, %arg7: memref<128x256xbf16, #tpu.memory_space<vmem>>, %arg8: memref<1x256xf32, #tpu.memory_space<vmem>>, %arg9: memref<128x128xbf16, #tpu.memory_space<vmem>>, %arg10: memref<1x128xf32, #tpu.memory_space<vmem>>, %arg11: memref<128x256xbf16, #tpu.memory_space<vmem>>, %arg12: memref<1x256xf32, #tpu.memory_space<vmem>>, %arg13: memref<8x256xf32, #tpu.memory_space<vmem>>, %arg14: memref<8x128xf32, #tpu.memory_space<vmem>>, %arg15: memref<8x128xf32, #tpu.memory_space<vmem>>, %arg16: memref<8x128xf32, #tpu.memory_space<vmem>>) attributes {dimension_semantics = [#tpu.dimension_semantics<parallel>], iteration_bounds = array<i64: 1>, scalar_prefetch = 0 : i64, scratch_operands = 0 : i64, tpu.core_type = #tpu.core_type<tc>, window_params = [{transform_indices = @transform_0, window_bounds = array<i64: 8, 256>}, {transform_indices = @transform_1, window_bounds = array<i64: 8, 128>}, {pipeline_mode = #tpu.pipeline_mode<synchronous>, transform_indices = @transform_2, window_bounds = array<i64: 256, 128>}, {pipeline_mode = #tpu.pipeline_mode<synchronous>, transform_indices = @transform_3, window_bounds = array<i64: 1, 128>}, {pipeline_mode = #tpu.pipeline_mode<synchronous>, transform_indices = @transform_4, window_bounds = array<i64: 128, 128>}, {pipeline_mode = #tpu.pipeline_mode<synchronous>, transform_indices = @transform_5, window_bounds = array<i64: 1, 128>}, {pipeline_mode = #tpu.pipeline_mode<synchronous>, transform_indices = @transform_6, window_bounds = array<i64: 128, 256>}, {pipeline_mode = #tpu.pipeline_mode<synchronous>, transform_indices = @transform_7, window_bounds = array<i64: 1, 256>}, {pipeline_mode = #tpu.pipeline_mode<synchronous>, transform_indices = @transform_8, window_bounds = array<i64: 128, 128>}, {pipeline_mode = #tpu.pipeline_mode<synchronous>, transform_indices = @transform_9, window_bounds = array<i64: 1, 128>}, {pipeline_mode = #tpu.pipeline_mode<synchronous>, transform_indices = @transform_10, window_bounds = array<i64: 128, 256>}, {pipeline_mode = #tpu.pipeline_mode<synchronous>, transform_indices = @transform_11, window_bounds = array<i64: 1, 256>}, {transform_indices = @transform_12, window_bounds = array<i64: 8, 256>}, {transform_indices = @transform_13, window_bounds = array<i64: 8, 128>}, {transform_indices = @transform_14, window_bounds = array<i64: 8, 128>}, {transform_indices = @transform_15, window_bounds = array<i64: 8, 128>}]} {
    %c0 = arith.constant 0 : index
    %c0_0 = arith.constant 0 : index
    %0 = vector.load %arg1[%c0, %c0_0] : memref<8x256xbf16, #tpu.memory_space<vmem>>, vector<8x256xbf16>
    %c0_1 = arith.constant 0 : index
    %c0_2 = arith.constant 0 : index
    %1 = vector.load %arg3[%c0_1, %c0_2] : memref<256x128xbf16, #tpu.memory_space<vmem>>, vector<256x128xbf16>
    %cst = arith.constant dense<0.000000e+00> : vector<8x128xf32>
    %2 = tpu.matmul %0, %1, %cst {dimension_numbers = #tpu.dot_dimension_numbers<[1], [0], [0], [1], [0, 0, 1, 1], [], []>} : vector<8x256xbf16>, vector<256x128xbf16>, vector<8x128xf32> -> vector<8x128xf32>
    %c0_3 = arith.constant 0 : index
    %c0_4 = arith.constant 0 : index
    %3 = vector.load %arg4[%c0_3, %c0_4] : memref<1x128xf32, #tpu.memory_space<vmem>>, vector<1x128xf32>
    %4 = vector.broadcast %3 : vector<1x128xf32> to vector<8x128xf32>
    %5 = arith.addf %2, %4 : vector<8x128xf32>
    %cst_5 = arith.constant 0.000000e+00 : f32
    %6 = vector.broadcast %cst_5 : f32 to vector<8x128xf32>
    %7 = arith.maximumf %5, %6 : vector<8x128xf32>
    %8 = arith.truncf %7 : vector<8x128xf32> to vector<8x128xbf16>
    %c0_6 = arith.constant 0 : index
    %c0_7 = arith.constant 0 : index
    %9 = vector.load %arg5[%c0_6, %c0_7] : memref<128x128xbf16, #tpu.memory_space<vmem>>, vector<128x128xbf16>
    %cst_8 = arith.constant dense<0.000000e+00> : vector<8x128xf32>
    %10 = tpu.matmul %8, %9, %cst_8 {dimension_numbers = #tpu.dot_dimension_numbers<[1], [0], [0], [1], [0, 0, 1, 1], [], []>} : vector<8x128xbf16>, vector<128x128xbf16>, vector<8x128xf32> -> vector<8x128xf32>
    %c0_9 = arith.constant 0 : index
    %c0_10 = arith.constant 0 : index
    %11 = vector.load %arg6[%c0_9, %c0_10] : memref<1x128xf32, #tpu.memory_space<vmem>>, vector<1x128xf32>
    %12 = vector.broadcast %11 : vector<1x128xf32> to vector<8x128xf32>
    %13 = arith.addf %10, %12 : vector<8x128xf32>
    %cst_11 = arith.constant 0.000000e+00 : f32
    %14 = vector.broadcast %cst_11 : f32 to vector<8x128xf32>
    %15 = arith.maximumf %13, %14 : vector<8x128xf32>
    %16 = arith.truncf %15 : vector<8x128xf32> to vector<8x128xbf16>
    %c0_12 = arith.constant 0 : index
    %c0_13 = arith.constant 0 : index
    %17 = vector.load %arg7[%c0_12, %c0_13] : memref<128x256xbf16, #tpu.memory_space<vmem>>, vector<128x256xbf16>
    %cst_14 = arith.constant dense<0.000000e+00> : vector<8x256xf32>
    %18 = tpu.matmul %16, %17, %cst_14 {dimension_numbers = #tpu.dot_dimension_numbers<[1], [0], [0], [1], [0, 0, 1, 1], [], []>} : vector<8x128xbf16>, vector<128x256xbf16>, vector<8x256xf32> -> vector<8x256xf32>
    %c0_15 = arith.constant 0 : index
    %c0_16 = arith.constant 0 : index
    %19 = vector.load %arg8[%c0_15, %c0_16] : memref<1x256xf32, #tpu.memory_space<vmem>>, vector<1x256xf32>
    %20 = vector.broadcast %19 : vector<1x256xf32> to vector<8x256xf32>
    %21 = arith.addf %18, %20 : vector<8x256xf32>
    %22 = vector.extract_strided_slice %21 {offsets = [0, 0], sizes = [8, 128], strides = [1, 1]} : vector<8x256xf32> to vector<8x128xf32>
    %23 = vector.extract_strided_slice %21 {offsets = [0, 128], sizes = [8, 128], strides = [1, 1]} : vector<8x256xf32> to vector<8x128xf32>
    %cst_17 = arith.constant 5.000000e-01 : f32
    %24 = vector.broadcast %cst_17 : f32 to vector<8x128xf32>
    %25 = arith.mulf %24, %23 : vector<8x128xf32>
    %26 = math.exp %25 : vector<8x128xf32>
    %c0_18 = arith.constant 0 : index
    %c0_19 = arith.constant 0 : index
    %27 = vector.load %arg2[%c0_18, %c0_19] : memref<8x128xf32, #tpu.memory_space<vmem>>, vector<8x128xf32>
    %28 = arith.mulf %26, %27 : vector<8x128xf32>
    %29 = arith.addf %28, %22 : vector<8x128xf32>
    %30 = arith.truncf %29 : vector<8x128xf32> to vector<8x128xbf16>
    %c0_20 = arith.constant 0 : index
    %c0_21 = arith.constant 0 : index
    %31 = vector.load %arg9[%c0_20, %c0_21] : memref<128x128xbf16, #tpu.memory_space<vmem>>, vector<128x128xbf16>
    %cst_22 = arith.constant dense<0.000000e+00> : vector<8x128xf32>
    %32 = tpu.matmul %30, %31, %cst_22 {dimension_numbers = #tpu.dot_dimension_numbers<[1], [0], [0], [1], [0, 0, 1, 1], [], []>} : vector<8x128xbf16>, vector<128x128xbf16>, vector<8x128xf32> -> vector<8x128xf32>
    %c0_23 = arith.constant 0 : index
    %c0_24 = arith.constant 0 : index
    %33 = vector.load %arg10[%c0_23, %c0_24] : memref<1x128xf32, #tpu.memory_space<vmem>>, vector<1x128xf32>
    %34 = vector.broadcast %33 : vector<1x128xf32> to vector<8x128xf32>
    %35 = arith.addf %32, %34 : vector<8x128xf32>
    %cst_25 = arith.constant 0.000000e+00 : f32
    %36 = vector.broadcast %cst_25 : f32 to vector<8x128xf32>
    %37 = arith.maximumf %35, %36 : vector<8x128xf32>
    %38 = arith.truncf %37 : vector<8x128xf32> to vector<8x128xbf16>
    %c0_26 = arith.constant 0 : index
    %c0_27 = arith.constant 0 : index
    %39 = vector.load %arg11[%c0_26, %c0_27] : memref<128x256xbf16, #tpu.memory_space<vmem>>, vector<128x256xbf16>
    %cst_28 = arith.constant dense<0.000000e+00> : vector<8x256xf32>
    %40 = tpu.matmul %38, %39, %cst_28 {dimension_numbers = #tpu.dot_dimension_numbers<[1], [0], [0], [1], [0, 0, 1, 1], [], []>} : vector<8x128xbf16>, vector<128x256xbf16>, vector<8x256xf32> -> vector<8x256xf32>
    %c0_29 = arith.constant 0 : index
    %c0_30 = arith.constant 0 : index
    %41 = vector.load %arg12[%c0_29, %c0_30] : memref<1x256xf32, #tpu.memory_space<vmem>>, vector<1x256xf32>
    %42 = vector.broadcast %41 : vector<1x256xf32> to vector<8x256xf32>
    %43 = arith.addf %40, %42 : vector<8x256xf32>
    %44 = arith.negf %43 : vector<8x256xf32>
    %45 = math.exp %44 : vector<8x256xf32>
    %cst_31 = arith.constant 1.000000e+00 : f32
    %46 = vector.broadcast %cst_31 : f32 to vector<8x256xf32>
    %47 = arith.addf %46, %45 : vector<8x256xf32>
    %48 = arith.divf %46, %47 : vector<8x256xf32>
    %c0_32 = arith.constant 0 : index
    %c0_33 = arith.constant 0 : index
    %49 = vector.load %arg13[%c0_32, %c0_33] : memref<8x256xf32, #tpu.memory_space<vmem>>, vector<8x256xf32>
    tpu.vector_store %arg13[%c0_32, %c0_33], %48 {strides = array<i32>} : memref<8x256xf32, #tpu.memory_space<vmem>>, vector<8x256xf32>,
    %c0_34 = arith.constant 0 : index
    %c0_35 = arith.constant 0 : index
    %50 = vector.load %arg14[%c0_34, %c0_35] : memref<8x128xf32, #tpu.memory_space<vmem>>, vector<8x128xf32>
    tpu.vector_store %arg14[%c0_34, %c0_35], %22 {strides = array<i32>} : memref<8x128xf32, #tpu.memory_space<vmem>>, vector<8x128xf32>,
    %c0_36 = arith.constant 0 : index
    %c0_37 = arith.constant 0 : index
    %51 = vector.load %arg15[%c0_36, %c0_37] : memref<8x128xf32, #tpu.memory_space<vmem>>, vector<8x128xf32>
    tpu.vector_store %arg15[%c0_36, %c0_37], %23 {strides = array<i32>} : memref<8x128xf32, #tpu.memory_space<vmem>>, vector<8x128xf32>,
    %c0_38 = arith.constant 0 : index
    %c0_39 = arith.constant 0 : index
    %52 = vector.load %arg16[%c0_38, %c0_39] : memref<8x128xf32, #tpu.memory_space<vmem>>, vector<8x128xf32>
    tpu.vector_store %arg16[%c0_38, %c0_39], %29 {strides = array<i32>} : memref<8x128xf32, #tpu.memory_space<vmem>>, vector<8x128xf32>,
    return
  }
  func.func @transform_0(%arg0: i32) -> (i32, i32) {
    %c0_i32 = arith.constant 0 : i32
    %c0_i32_0 = arith.constant 0 : i32
    return %arg0, %c0_i32 : i32, i32
  }
  func.func @transform_1(%arg0: i32) -> (i32, i32) {
    %c0_i32 = arith.constant 0 : i32
    %c0_i32_0 = arith.constant 0 : i32
    return %arg0, %c0_i32 : i32, i32
  }
  func.func @transform_2(%arg0: i32) -> (i32, i32) {
    %c0_i32 = arith.constant 0 : i32
    %c0_i32_0 = arith.constant 0 : i32
    %c0_i32_1 = arith.constant 0 : i32
    return %c0_i32, %c0_i32_0 : i32, i32
  }
  func.func @transform_3(%arg0: i32) -> (i32, i32) {
    %c0_i32 = arith.constant 0 : i32
    %c0_i32_0 = arith.constant 0 : i32
    %c0_i32_1 = arith.constant 0 : i32
    return %c0_i32, %c0_i32_0 : i32, i32
  }
  func.func @transform_4(%arg0: i32) -> (i32, i32) {
    %c0_i32 = arith.constant 0 : i32
    %c0_i32_0 = arith.constant 0 : i32
    %c0_i32_1 = arith.constant 0 : i32
    return %c0_i32, %c0_i32_0 : i32, i32
  }
  func.func @transform_5(%arg0: i32) -> (i32, i32) {
    %c0_i32 = arith.constant 0 : i32
    %c0_i32_0 = arith.constant 0 : i32
    %c0_i32_1 = arith.constant 0 : i32
    return %c0_i32, %c0_i32_0 : i32, i32
  }
  func.func @transform_6(%arg0: i32) -> (i32, i32) {
    %c0_i32 = arith.constant 0 : i32
    %c0_i32_0 = arith.constant 0 : i32
    %c0_i32_1 = arith.constant 0 : i32
    return %c0_i32, %c0_i32_0 : i32, i32
  }
  func.func @transform_7(%arg0: i32) -> (i32, i32) {
    %c0_i32 = arith.constant 0 : i32
    %c0_i32_0 = arith.constant 0 : i32
    %c0_i32_1 = arith.constant 0 : i32
    return %c0_i32, %c0_i32_0 : i32, i32
  }
  func.func @transform_8(%arg0: i32) -> (i32, i32) {
    %c0_i32 = arith.constant 0 : i32
    %c0_i32_0 = arith.constant 0 : i32
    %c0_i32_1 = arith.constant 0 : i32
    return %c0_i32, %c0_i32_0 : i32, i32
  }
  func.func @transform_9(%arg0: i32) -> (i32, i32) {
    %c0_i32 = arith.constant 0 : i32
    %c0_i32_0 = arith.constant 0 : i32
    %c0_i32_1 = arith.constant 0 : i32
    return %c0_i32, %c0_i32_0 : i32, i32
  }
  func.func @transform_10(%arg0: i32) -> (i32, i32) {
    %c0_i32 = arith.constant 0 : i32
    %c0_i32_0 = arith.constant 0 : i32
    %c0_i32_1 = arith.constant 0 : i32
    return %c0_i32, %c0_i32_0 : i32, i32
  }
  func.func @transform_11(%arg0: i32) -> (i32, i32) {
    %c0_i32 = arith.constant 0 : i32
    %c0_i32_0 = arith.constant 0 : i32
    %c0_i32_1 = arith.constant 0 : i32
    return %c0_i32, %c0_i32_0 : i32, i32
  }
  func.func @transform_12(%arg0: i32) -> (i32, i32) {
    %c0_i32 = arith.constant 0 : i32
    %c0_i32_0 = arith.constant 0 : i32
    return %arg0, %c0_i32 : i32, i32
  }
  func.func @transform_13(%arg0: i32) -> (i32, i32) {
    %c0_i32 = arith.constant 0 : i32
    %c0_i32_0 = arith.constant 0 : i32
    return %arg0, %c0_i32 : i32, i32
  }
  func.func @transform_14(%arg0: i32) -> (i32, i32) {
    %c0_i32 = arith.constant 0 : i32
    %c0_i32_0 = arith.constant 0 : i32
    return %arg0, %c0_i32 : i32, i32
  }
  func.func @transform_15(%arg0: i32) -> (i32, i32) {
    %c0_i32 = arith.constant 0 : i32
    %c0_i32_0 = arith.constant 0 : i32
    return %arg0, %c0_i32 : i32, i32
  }
}

</mosaic_0001>

<bundles_post_ra>
// kernel: vae_forward.1
= control target key start
LH: loop header
LB: loop body
LE: loop exit
PB: predicated region body
PF: predicated region fallthrough
CT: control target
= control target key end

     0   :  { %21 = vsyncpa [#allocation3], 0  ;;  %s1597_s0 = inlined_call_operand.vmem [shape: bf16[8,256], index: 0, kind: input, shape index: {}]   ;;  %s1598_s1 = inlined_call_operand.vmem [shape: f32[8,128], index: 1, kind: input, shape index: {}]   ;;  %s1599_s2 = inlined_call_operand.vmem [shape: bf16[256,128], index: 2, kind: input, shape index: {}]   ;;  %s1600_s3 = inlined_call_operand.vmem [shape: f32[1,128], index: 3, kind: input, shape index: {}]   ;;  %s1601_s4 = inlined_call_operand.vmem [shape: bf16[128,128], index: 4, kind: input, shape index: {}]   ;;  %s1602_s5 = inlined_call_operand.vmem [shape: f32[1,128], index: 5, kind: input, shape index: {}]   ;;  %s1603_s6 = inlined_call_operand.vmem [shape: bf16[128,256], index: 6, kind: input, shape index: {}]   ;;  %s1604_s7 = inlined_call_operand.vmem [shape: f32[1,256], index: 7, kind: input, shape index: {}]   ;;  %s1605_s8 = inlined_call_operand.vmem [shape: bf16[128,128], index: 8, kind: input, shape index: {}]   ;;  %s1606_s9 = inlined_call_operand.vmem [shape: f32[1,128], index: 9, kind: input, shape index: {}]   ;;  %s1607_s10 = inlined_call_operand.vmem [shape: bf16[128,256], index: 10, kind: input, shape index: {}]   ;;  %s1608_s11 = inlined_call_operand.vmem [shape: f32[1,256], index: 11, kind: input, shape index: {}]   ;;  %s1609_s12 = inlined_call_operand.hbm [shape: f32[8,256], index: 12, kind: output, shape index: {0}]   ;;  %s1610_s13 = inlined_call_operand.hbm [shape: f32[8,128], index: 13, kind: output, shape index: {1}]   ;;  %s1611_s14 = inlined_call_operand.hbm [shape: f32[8,128], index: 14, kind: output, shape index: {2}]   ;;  %s1612_s15 = inlined_call_operand.hbm [shape: f32[8,128], index: 15, kind: output, shape index: {3}]  }
   0x1   :  { %22 = vsyncpa [#allocation5], 0  ;;  %v1016_v0 = vld [vmem:[%s1599_s2 + $0x38] sm:$0xff]  ;;  %v1015_v2 = vld [vmem:[%s1599_s2 + $0x30] sm:$0xff] }
   0x2   :  { %v1024_v1 = vld [vmem:[%s1599_s2 + $0x78] sm:$0xff]  ;;  %188 = vmatpush.bf16.msra.mxu0 %v1016_v0  ;;  %v1023_v3 = vld [vmem:[%s1599_s2 + $0x70] sm:$0xff]  ;;  %v1014_v5 = vld [vmem:[%s1599_s2 + $0x28] sm:$0xff] }
   0x3   :  { %201 = vmatpush.bf16.msra.mxu1 %v1024_v1  ;;  %v1032_v4 = vld [vmem:[%s1601_s4 + $0x38] sm:$0xff]  ;;  %v1022_v6 = vld [vmem:[%s1599_s2 + $0x68] sm:$0xff]  ;;  %v1031_v7 = vld [vmem:[%s1601_s4 + $0x30] sm:$0xff] }
   0x4   :  { %284 = vmatpush.bf16.msra.mxu2 %v1032_v4 }
   0x6   :  { %189 = vmatpush.bf16.msra.mxu0 %v1015_v2 }
   0x7   :  { %202 = vmatpush.bf16.msra.mxu1 %v1023_v3 }
   0x8   :  { %23 = vsyncpa [#allocation8], 0  ;;  %v1013_v8 = vld [vmem:[%s1599_s2 + $0x20] sm:$0xff]  ;;  %285 = vmatpush.bf16.msra.mxu2 %v1031_v7  ;;  %v1030_v10 = vld [vmem:[%s1601_s4 + $0x28] sm:$0xff]  ;;  %s706_s16 = sshll.u32 %s1610_s13, 4  ;;  %s1192_s17 = smov [#allocation4]   ;;  %s707_s16 = int_to_ptr.hbm [resolvable:$true] %s706_s16 }
   0x9   :  { %v1021_v9 = vld [vmem:[%s1599_s2 + $0x60] sm:$0xff]  ;;  %v1012_v11 = vld [vmem:[%s1599_s2 + $0x18] sm:$0xff]  ;;  %v1011_v14 = vld [vmem:[%s1599_s2 + $0x10] sm:$0xff]  ;;  %s1193_s18 = smov [#allocation6]   ;;  %s717_s20 = sshll.u32 %s1611_s14, 4  ;;  %s718_s20 = int_to_ptr.hbm [resolvable:$true] %s717_s20 }
   0xa   :  { %190 = vmatpush.bf16.msra.mxu0 %v1014_v5  ;;  %v1020_v12 = vld [vmem:[%s1599_s2 + $0x58] sm:$0xff]  ;;  %v1029_v13 = vld [vmem:[%s1601_s4 + $0x20] sm:$0xff]  ;;  %v1019_v15 = vld [vmem:[%s1599_s2 + $0x50] sm:$0xff]  ;;  %s695_s23 = sshll.u32 %s1609_s12, 4  ;;  %s696_s23 = int_to_ptr.hbm [resolvable:$true] %s695_s23 }
   0xb   :  { %203 = vmatpush.bf16.msra.mxu1 %v1022_v6  ;;  %v1028_v16 = vld [vmem:[%s1601_s4 + $0x18] sm:$0xff]  ;;  %v1010_v17 = vld [vmem:[%s1599_s2 + $0x8] sm:$0xff]  ;;  %v48_v19 = vld [vmem:[%s1597_s0] sm:$0xff]  ;;  %s715_s0 = sshll.u32 %s1193_s18, 4  ;;  %s716_s0 = int_to_ptr.vmem [resolvable:$true] %s715_s0 }
   0xc   :  { %286 = vmatpush.bf16.msra.mxu2 %v1030_v10  ;;  %v1018_v18 = vld [vmem:[%s1599_s2 + $0x48] sm:$0xff]  ;;  %v1027_v20 = vld [vmem:[%s1601_s4 + $0x10] sm:$0xff]  ;;  %v86_v21 = vunpack.c.l.b16 %v48_v19  ;;  %v87_v22 = vunpack.c.h.b16 %v48_v19  ;;  %v1009_v23 = vld [vmem:[%s1599_s2] sm:$0xff] }
   0xd   :  { %v1017_v24 = vld [vmem:[%s1599_s2 + $0x40] sm:$0xff]  ;;  %v1026_v27 = vld [vmem:[%s1601_s4 + $0x8] sm:$0xff]  ;;  %v905_v29 = vld [vmem:[%s1603_s6 + $0x70] sm:$0xf] }
   0xe   :  { %191 = vmatpush.bf16.msra.mxu0 %v1013_v8  ;;  %v88_v25 = vpack.c.b16 %v86_v21, %v86_v21  ;;  %v89_v26 = vpack.c.b16 %v87_v22, %v87_v22  ;;  %v1025_v28 = vld [vmem:[%s1601_s4] sm:$0xff]  ;;  %v1048_v30 = vld [vmem:[%s1603_s6 + $0x74] sm:$0xf0]  ;;  %v1047_v31 = vld [vmem:[%s1603_s6 + $0x74] sm:$0xf] }
   0xf   :  { %204 = vmatpush.bf16.msra.mxu1 %v1021_v9  ;;  %v906_v32 = vor.u32 %v1048_v30, %v905_v29  ;;  %v907_v33 = vld [vmem:[%s1603_s6 + $0x78] sm:$0xf0]  ;;  %v897_v34 = vld [vmem:[%s1603_s6 + $0x60] sm:$0xf]  ;;  %v1046_v35 = vld [vmem:[%s1603_s6 + $0x64] sm:$0xf0] }
  0x10   :  { %287 = vmatpush.bf16.msra.mxu2 %v1029_v13  ;;  %v910_v36 = vor.u32 %v1047_v31, %v907_v33  ;;  %v1045_v37 = vld [vmem:[%s1603_s6 + $0x64] sm:$0xf]  ;;  %v899_v38 = vld [vmem:[%s1603_s6 + $0x68] sm:$0xf0]  ;;  %v898_v39 = vor.u32 %v1046_v35, %v897_v34  ;;  %v889_v41 = vld [vmem:[%s1603_s6 + $0x50] sm:$0xf] }
  0x11   :  { %401 = vmatpush.bf16.msra.mxu3 %v906_v32  ;;  %v902_v40 = vor.u32 %v1045_v37, %v899_v38  ;;  %v1044_v42 = vld [vmem:[%s1603_s6 + $0x54] sm:$0xf0]  ;;  %v1043_v43 = vld [vmem:[%s1603_s6 + $0x54] sm:$0xf]  ;;  %v891_v44 = vld [vmem:[%s1603_s6 + $0x58] sm:$0xf0] }
  0x12   :  { %192 = vmatpush.bf16.msra.mxu0 %v1012_v11  ;;  %v890_v45 = vor.u32 %v1044_v42, %v889_v41  ;;  %v894_v46 = vor.u32 %v1043_v43, %v891_v44  ;;  %v881_v47 = vld [vmem:[%s1603_s6 + $0x40] sm:$0xf]  ;;  %v1042_v48 = vld [vmem:[%s1603_s6 + $0x44] sm:$0xf0]  ;;  %v1041_v49 = vld [vmem:[%s1603_s6 + $0x44] sm:$0xf] }
  0x13   :  { %205 = vmatpush.bf16.msra.mxu1 %v1020_v12  ;;  %v883_v50 = vld [vmem:[%s1603_s6 + $0x48] sm:$0xf0]  ;;  %v882_v51 = vor.u32 %v1042_v48, %v881_v47  ;;  %v873_v53 = vld [vmem:[%s1603_s6 + $0x30] sm:$0xf]  ;;  %v1040_v54 = vld [vmem:[%s1603_s6 + $0x34] sm:$0xf0] }
  0x14   :  { %288 = vmatpush.bf16.msra.mxu2 %v1028_v16  ;;  %v886_v52 = vor.u32 %v1041_v49, %v883_v50  ;;  %v1039_v55 = vld [vmem:[%s1603_s6 + $0x34] sm:$0xf]  ;;  %v875_v56 = vld [vmem:[%s1603_s6 + $0x38] sm:$0xf0]  ;;  %v874_v57 = vor.u32 %v1040_v54, %v873_v53  ;;  %v865_v59 = vld [vmem:[%s1603_s6 + $0x20] sm:$0xf] }
  0x15   :  { %402 = vmatpush.bf16.msra.mxu3 %v898_v39  ;;  %v878_v58 = vor.u32 %v1039_v55, %v875_v56  ;;  %v1038_v60 = vld [vmem:[%s1603_s6 + $0x24] sm:$0xf0]  ;;  %v1037_v61 = vld [vmem:[%s1603_s6 + $0x24] sm:$0xf]  ;;  %v867_v62 = vld [vmem:[%s1603_s6 + $0x28] sm:$0xf0] }
  0x16   :  { %193 = vmatpush.bf16.msra.mxu0 %v1011_v14  ;;  %v866_v63 = vor.u32 %v1038_v60, %v865_v59  ;;  %v1077_v0 = vld [vmem:[%s1600_s3] ss:$0 sm:$0xff]  ;;  %v870_v1 = vor.u32 %v1037_v61, %v867_v62  ;;  %v857_v10 = vld [vmem:[%s1603_s6 + $0x10] sm:$0xf]  ;;  %v1036_v11 = vld [vmem:[%s1603_s6 + $0x14] sm:$0xf0] }
  0x17   :  { %206 = vmatpush.bf16.msra.mxu1 %v1019_v15  ;;  %v1035_v12 = vld [vmem:[%s1603_s6 + $0x14] sm:$0xf]  ;;  %v858_v13 = vor.u32 %v1036_v11, %v857_v10  ;;  %v859_v14 = vld [vmem:[%s1603_s6 + $0x18] sm:$0xf0]  ;;  %v849_v16 = vld [vmem:[%s1603_s6] sm:$0xf] }
  0x18   :  { %289 = vmatpush.bf16.msra.mxu2 %v1027_v20  ;;  %v862_v15 = vor.u32 %v1035_v12, %v859_v14  ;;  %v851_v20 = vld [vmem:[%s1603_s6 + $0x8] sm:$0xf0]  ;;  %v1056_v22 = vld [vmem:[%s1605_s8 + $0x38] sm:$0xff]  ;;  %v1053_v31 = vld [vmem:[%s1605_s8 + $0x20] sm:$0xff] }
  0x19   :  { %403 = vmatpush.bf16.msra.mxu3 %v890_v45  ;;  %v1052_v32 = vld [vmem:[%s1605_s8 + $0x18] sm:$0xff]  ;;  %v1051_v33 = vld [vmem:[%s1605_s8 + $0x10] sm:$0xff]  ;;  %v1050_v34 = vld [vmem:[%s1605_s8 + $0x8] sm:$0xff] }
  0x1a   :  { %194 = vmatpush.bf16.msra.mxu0 %v1010_v17  ;;  %v1034_v17 = vld [vmem:[%s1603_s6 + $0x4] sm:$0xf0]  ;;  %v1049_v35 = vld [vmem:[%s1605_s8] sm:$0xff]  ;;  %v1072_v37 = vld [vmem:[%s1607_s10 + $0x74] sm:$0xf0] }
  0x1b   :  { %207 = vmatpush.bf16.msra.mxu1 %v1018_v18  ;;  %v1033_v18 = vld [vmem:[%s1603_s6 + $0x4] sm:$0xf]  ;;  %v850_v19 = vor.u32 %v1034_v17, %v849_v16  ;;  %v1071_v38 = vld [vmem:[%s1607_s10 + $0x74] sm:$0xf]  ;;  %v993_v41 = vld [vmem:[%s1607_s10 + $0x60] sm:$0xf] }
  0x1c   :  { %290 = vmatpush.bf16.msra.mxu2 %v1026_v27  ;;  %v854_v21 = vor.u32 %v1033_v18, %v851_v20  ;;  %v1070_v42 = vld [vmem:[%s1607_s10 + $0x64] sm:$0xf0]  ;;  %v1069_v44 = vld [vmem:[%s1607_s10 + $0x64] sm:$0xf]  ;;  %v995_v45 = vld [vmem:[%s1607_s10 + $0x68] sm:$0xf0] }
  0x1d   :  { %404 = vmatpush.bf16.msra.mxu3 %v882_v51  ;;  %v998_v47 = vor.u32 %v1069_v44, %v995_v45  ;;  %v985_v48 = vld [vmem:[%s1607_s10 + $0x50] sm:$0xf]  ;;  %v1068_v49 = vld [vmem:[%s1607_s10 + $0x54] sm:$0xf0]  ;;  %v1067_v50 = vld [vmem:[%s1607_s10 + $0x54] sm:$0xf] }
  0x1e   :  { %195 = vmatpush.bf16.msra.mxu0 %v1009_v23  ;;  %v1055_v23 = vld [vmem:[%s1605_s8 + $0x30] sm:$0xff]  ;;  %v987_v51 = vld [vmem:[%s1607_s10 + $0x58] sm:$0xf0]  ;;  %v986_v53 = vor.u32 %v1068_v49, %v985_v48  ;;  %v977_v55 = vld [vmem:[%s1607_s10 + $0x40] sm:$0xf]  ;;  %s728_s6 = sshll.u32 %s1612_s15, 4  ;;  %s729_s6 = int_to_ptr.hbm [resolvable:$true] %s728_s6 }
  0x1f   :  { %208 = vmatpush.bf16.msra.mxu1 %v1017_v24  ;;  %v1054_v24 = vld [vmem:[%s1605_s8 + $0x28] sm:$0xff]  ;;  %v990_v54 = vor.u32 %v1067_v50, %v987_v51  ;;  %v1061_v11 = vld [vmem:[%s1607_s10 + $0x24] sm:$0xf] }
  0x20   :  { %291 = vmatpush.bf16.msra.mxu2 %v1025_v28  ;;  %v1066_v56 = vld [vmem:[%s1607_s10 + $0x44] sm:$0xf0]  ;;  %v979_v59 = vld [vmem:[%s1607_s10 + $0x48] sm:$0xf0]  ;;  %v430_v18 = vld [vmem:[%s1598_s1] sm:$0xff] }
  0x21   :  { %196 = vmatmul.bf16.vlgmr.msra.gmra.mxu0 %v88_v25  ;;  %405 = vmatpush.bf16.msra.mxu3 %v874_v57  ;;  %v1078_v25 = vld [vmem:[%s1602_s5] ss:$0 sm:$0xff]  ;;  %v978_v60 = vor.u32 %v1066_v56, %v977_v55  ;;  %v963_v12 = vld [vmem:[%s1607_s10 + $0x28] sm:$0xf0] }
  0x22   :  { %209 = vmatmul.bf16.vlgmr.msra.gmra.mxu1 %v89_v26  ;;  %414 = vmatpush.bf16.msrb.mxu0 %v910_v36  ;;  %v1001_v36 = vld [vmem:[%s1607_s10 + $0x70] sm:$0xf]  ;;  %v966_v17 = vor.u32 %v1061_v11, %v963_v12 }
  0x23   :  { %502 = vmatpush.bf16.msrb.mxu1 %v1056_v22  ;;  %v1002_v39 = vor.u32 %v1072_v37, %v1001_v36  ;;  %v1079_v36 = vld [vmem:[%s1606_s9] ss:$0 sm:$0xff] }
  0x25   :  { %406 = vmatpush.bf16.msra.mxu3 %v866_v63  ;;  %619 = vmatpush.bf16.msrb.mxu2 %v1002_v39  ;;  %v969_v63 = vld [vmem:[%s1607_s10 + $0x30] sm:$0xf] }
  0x26   :  { %415 = vmatpush.bf16.msrb.mxu0 %v902_v40  ;;  %v1003_v40 = vld [vmem:[%s1607_s10 + $0x78] sm:$0xf0] }
  0x27   :  { %503 = vmatpush.bf16.msrb.mxu1 %v1055_v23  ;;  %v1006_v43 = vor.u32 %v1071_v38, %v1003_v40 }
  0x29   :  { %407 = vmatpush.bf16.msra.mxu3 %v858_v13 }
  0x2a   :  { %416 = vmatpush.bf16.msrb.mxu0 %v894_v46  ;;  %v994_v46 = vor.u32 %v1070_v42, %v993_v41  ;;  %v533_v42 = vld [vmem:[%s1608_s11] sm:$0x3]  ;;  %s1195_s11 = smov [#allocation2]  }
  0x2b   :  { %504 = vmatpush.bf16.msrb.mxu1 %v1054_v24  ;;  %v953_v24 = vld [vmem:[%s1607_s10 + $0x10] sm:$0xf]  ;;  %v536_v44 = vperm.slane %v533_v42, 1  ;;  %s693_s14 = sshll.u32 %s1195_s11, 4  ;;  %s694_s14 = int_to_ptr.vmem [resolvable:$true] %s693_s14 }
  0x2c   :  { %620 = vmatpush.bf16.msrb.mxu2 %v994_v46 }
  0x2d   :  { %408 = vmatpush.bf16.msra.mxu3 %v850_v19 }
  0x2e   :  { %417 = vmatpush.bf16.msrb.mxu0 %v886_v52  ;;  %v315_v52 = vld [vmem:[%s1604_s7] sm:$0x3]  ;;  %s1194_s7 = smov [#allocation7]  }
  0x2f   :  { %505 = vmatpush.bf16.msrb.mxu1 %v1053_v31  ;;  %v318_v57 = vperm.slane %v315_v52, 1  ;;  %v1058_v31 = vld [vmem:[%s1607_s10 + $0x4] sm:$0xf0]  ;;  %s726_s13 = sshll.u32 %s1194_s7, 4  ;;  %s727_s13 = int_to_ptr.vmem [resolvable:$true] %s726_s13 }
  0x30   :  { %621 = vmatpush.bf16.msrb.mxu2 %v986_v53 }
  0x31   :  { %632 = vmatpush.bf16.msrb.mxu3 %v1006_v43  ;;  %v535_v43 = vperm.slane %v533_v42, 0 }
  0x32   :  { %418 = vmatpush.bf16.msrb.mxu0 %v878_v58  ;;  %v1065_v58 = vld [vmem:[%s1607_s10 + $0x44] sm:$0xf] }
  0x33   :  { %506 = vmatpush.bf16.msrb.mxu1 %v1052_v32  ;;  %v982_v62 = vor.u32 %v1065_v58, %v979_v59  ;;  %v1057_v32 = vld [vmem:[%s1607_s10 + $0x4] sm:$0xf] }
  0x34   :  { %622 = vmatpush.bf16.msrb.mxu2 %v978_v60 }
  0x35   :  { %633 = vmatpush.bf16.msrb.mxu3 %v998_v47 }
  0x36   :  { %419 = vmatpush.bf16.msrb.mxu0 %v870_v1 }
  0x37   :  { %507 = vmatpush.bf16.msrb.mxu1 %v1051_v33 }
  0x39   :  { %634 = vmatpush.bf16.msrb.mxu3 %v990_v54 }
  0x3a   :  { %420 = vmatpush.bf16.msrb.mxu0 %v862_v15 }
  0x3b   :  { %508 = vmatpush.bf16.msrb.mxu1 %v1050_v34  ;;  %v947_v34 = vld [vmem:[%s1607_s10 + $0x8] sm:$0xf0] }
  0x3d   :  { %635 = vmatpush.bf16.msrb.mxu3 %v982_v62 }
  0x3e   :  { %421 = vmatpush.bf16.msrb.mxu0 %v854_v21 }
  0x3f   :  { %509 = vmatpush.bf16.msrb.mxu1 %v1049_v35  ;;  %v950_v35 = vor.u32 %v1057_v32, %v947_v34 }
  0x9e   :  { %v197_v2 = vpop.f32.mrf.mxu0 }
  0x9f   :  { %v210_v3 = vpop.f32.mrf.mxu1  ;;  %v198_v4 = vadd.f32 %v1077_v0, %v197_v2  ;;  %v1064_v0 = vld [vmem:[%s1607_s10 + $0x34] sm:$0xf0]  ;;  %v1063_v2 = vld [vmem:[%s1607_s10 + $0x34] sm:$0xf] }
  0xa1   :  { %v211_v5 = vadd.f32 %v210_v3, %v198_v4  ;;  %v971_v3 = vld [vmem:[%s1607_s10 + $0x38] sm:$0xf0] }
  0xa3   :  { %v214_v6 = vmax.f32 %v211_v5, 0.0  ;;  %v317_v5 = vperm.slane %v315_v52, 0 }
  0xa5   :  { %v215_v7 = vpack.c.bf16 %v214_v6, %v214_v6  ;;  %v970_v6 = vor.u32 %v1064_v0, %v969_v63 }
  0xa6   :  { %v199_v8 = vpop.f32.mrf.mxu0 }
  0xa7   :  { %v212_v9 = vpop.f32.mrf.mxu1  ;;  %292 = vmatmul.bf16.vlgmr.msra.gmra.mxu2 %v215_v7  ;;  %v974_v7 = vor.u32 %v1063_v2, %v971_v3  ;;  %v961_v8 = vld [vmem:[%s1607_s10 + $0x20] sm:$0xf] }
  0xa8   :  { %v1062_v9 = vld [vmem:[%s1607_s10 + $0x24] sm:$0xf0]  ;;  %623 = vmatpush.bf16.msrb.mxu2 %v970_v6 }
  0xa9   :  { %v962_v15 = vor.u32 %v1062_v9, %v961_v8  ;;  %636 = vmatpush.bf16.msrb.mxu3 %v974_v7 }
  0xac   :  { %624 = vmatpush.bf16.msrb.mxu2 %v962_v15 }
  0xad   :  { %637 = vmatpush.bf16.msrb.mxu3 %v966_v17 }
 0x12a   :  { %v293_v26 = vpop.f32.mrf.mxu2 }
 0x12b   :  { %v294_v27 = vadd.f32 %v1078_v25, %v293_v26  ;;  %v1060_v25 = vld [vmem:[%s1607_s10 + $0x14] sm:$0xf0]  ;;  %v1059_v26 = vld [vmem:[%s1607_s10 + $0x14] sm:$0xf] }
 0x12d   :  { %v297_v28 = vmax.f32 %v294_v27, 0.0  ;;  %v954_v27 = vor.u32 %v1060_v25, %v953_v24 }
 0x12f   :  { %v298_v29 = vpack.c.bf16 %v297_v28, %v297_v28  ;;  %v955_v28 = vld [vmem:[%s1607_s10 + $0x18] sm:$0xf0]  ;;  %625 = vmatpush.bf16.msrb.mxu2 %v954_v27 }
 0x131   :  { %409 = vmatmul.bf16.vlgmr.msra.gmra.mxu3 %v298_v29  ;;  %422 = vmatmul.bf16.vlgmr.msrb.gmra.mxu0 %v298_v29  ;;  %v958_v29 = vor.u32 %v1059_v26, %v955_v28 }
 0x132   :  { %v295_v30 = vpop.f32.mrf.mxu2 }
 0x133   :  { %638 = vmatpush.bf16.msrb.mxu3 %v958_v29  ;;  %v945_v30 = vld [vmem:[%s1607_s10] sm:$0xf]  ;;  %s704_s10 = sshll.u32 %s1192_s17, 4  ;;  %s705_s10 = int_to_ptr.vmem [resolvable:$true] %s704_s10 }
 0x134   :  { %v946_v33 = vor.u32 %v1058_v31, %v945_v30 }
 0x136   :  { %626 = vmatpush.bf16.msrb.mxu2 %v946_v33 }
 0x137   :  { %639 = vmatpush.bf16.msrb.mxu3 %v950_v35 }
 0x1ae   :  { %v423_v61 = vpop.f32.mrf.mxu0 }
 0x1af   :  { %v424_v1 = vadd.f32 %v423_v61, %v318_v57 }
 0x1b1   :  { %v427_v4 = vmul.f32 0.5, %v424_v1  ;;  %686 = vst [vmem:[#allocation6] sm:$0xff] %v424_v1 }
 0x1b3   :  { %v428_v10 = vmul.f32 1.442695, %v427_v4 }
 0x1b4   :  { %v410_v13 = vpop.f32.mrf.mxu3 }
 0x1b5   :  { %1080 = vpow2.f32 %v428_v10  ;;  %v411_v14 = vadd.f32 %v410_v13, %v317_v5 }
 0x1b6   :  { %v425_v16 = vpop.f32.mrf.mxu0 }
 0x1b7   :  { %685 = vst [vmem:[#allocation4] sm:$0xff] %v411_v14 }
 0x1b8   :  { %709 = dma.vmem_to_hbm [thread:$0]  %s705_s10, 128, %s707_s16, [#allocation5]  }
 0x1b9   :  { %720 = dma.vmem_to_hbm [thread:$0]  %s716_s0, 128, %s718_s20, [#allocation5]  }
 0x1bb   :  { %v1081_v19 = vpop.eup %1080 }
 0x1bc   :  { %v431_v20 = vmul.f32 %v1081_v19, %v430_v18  ;;  %v412_v21 = vpop.f32.mrf.mxu3 }
 0x1be   :  { %v432_v22 = vadd.f32 %v431_v20, %v411_v14 }
 0x1c0   :  { %687 = vst [vmem:[#allocation7] sm:$0xff] %v432_v22  ;;  %v433_v23 = vpack.c.bf16 %v432_v22, %v432_v22 }
 0x1c1   :  { %731 = dma.vmem_to_hbm [thread:$0]  %s727_s13, 128, %s729_s6, [#allocation8]  }
 0x1c2   :  { %510 = vmatmul.bf16.vlgmr.msrb.gmra.mxu1 %v433_v23 }
 0x23f   :  { %v511_v37 = vpop.f32.mrf.mxu1 }
 0x240   :  { %v512_v38 = vadd.f32 %v1079_v36, %v511_v37 }
 0x242   :  { %v515_v39 = vmax.f32 %v512_v38, 0.0 }
 0x244   :  { %v516_v40 = vpack.c.bf16 %v515_v39, %v515_v39 }
 0x246   :  { %627 = vmatmul.bf16.vlgmr.msrb.gmra.mxu2 %v516_v40  ;;  %640 = vmatmul.bf16.vlgmr.msrb.gmra.mxu3 %v516_v40 }
 0x247   :  { %v513_v41 = vpop.f32.mrf.mxu1 }
 0x2c9   :  { %v628_v45 = vpop.f32.mrf.mxu2  ;;  %v641_v46 = vpop.f32.mrf.mxu3 }
 0x2ca   :  { %v629_v47 = vadd.f32 %v628_v45, %v535_v43  ;;  %v642_v48 = vadd.f32 %v641_v46, %v536_v44 }
 0x2cc   :  { %v1007_v49 = vmul.f32 -1.442695, %v629_v47  ;;  %v1008_v50 = vmul.f32 -1.442695, %v642_v48 }
 0x2ce   :  { %1082 = vpow2.f32 %v1007_v49 }
 0x2cf   :  { %1084 = vpow2.f32 %v1008_v50 }
 0x2d1   :  { %v630_v51 = vpop.f32.mrf.mxu2  ;;  %v643_v52 = vpop.f32.mrf.mxu3 }
 0x2d4   :  { %v1083_v53 = vpop.eup %1082 }
 0x2d5   :  { %v1085_v54 = vpop.eup %1084  ;;  %v651_v55 = vadd.f32 1.0, %v1083_v53 }
 0x2d6   :  { %v652_v56 = vadd.f32 1.0, %v1085_v54 }
 0x2d7   :  { %1086 = vrcp.f32 %v651_v55  ;;  %v664_v62 = vand.u32 2147483648, %v651_v55  ;;  %v662_v1 = vand.u32 2147483647, %v651_v55  ;;  %vm658_vm2 = vweird.f32 %v651_v55 }
 0x2d8   :  { %1088 = vrcp.f32 %v652_v56  ;;  %v679_v2 = vand.u32 2147483648, %v652_v56  ;;  %v677_v4 = vand.u32 2147483647, %v652_v56  ;;  %vm673_vm4 = vweird.f32 %v652_v56 }
 0x2d9   :  { %v665_v6 = vor.u32 1.1754944e-38, %v664_v62  ;;  %vm663_vm5 = vcmp.eq.f32.partialorder %v662_v1, 8.507059e+37 }
 0x2da   :  { %v680_v9 = vor.u32 1.1754944e-38, %v679_v2  ;;  %vm678_vm7 = vcmp.eq.f32.partialorder %v677_v4, 8.507059e+37 }
 0x2dd   :  { %v1087_v57 = vpop.eup %1086 }
 0x2de   :  { %v1089_v58 = vpop.eup %1088  ;;  %v654_v59 = vmul.f32 %v1087_v57, %v651_v55  ;;  %vm659_vm0 = vweird.f32 %v1087_v57 }
 0x2df   :  { %v669_v60 = vmul.f32 %v1089_v58, %v652_v56  ;;  %vm674_vm1 = vweird.f32 %v1089_v58  ;;  %vm660_vm3 = vmor %vm658_vm2, %vm659_vm0 }
 0x2e0   :  { %v655_v61 = vsub.f32 1.0, %v654_v59  ;;  %vm675_vm6 = vmor %vm673_vm4, %vm674_vm1 }
 0x2e1   :  { %v670_v63 = vsub.f32 1.0, %v669_v60 }
 0x2e2   :  { %v656_v0 = vmul.f32 %v1087_v57, %v655_v61 }
 0x2e3   :  { %v671_v3 = vmul.f32 %v1089_v58, %v670_v63 }
 0x2e4   :  { %v657_v5 = vadd.f32 %v1087_v57, %v656_v0 }
 0x2e5   :  { %v672_v7 = vadd.f32 %v1089_v58, %v671_v3 }
 0x2e6   :  { %v661_v8 = vsel %vm660_vm3, %v1087_v57, %v657_v5 }
 0x2e7   :  { %v666_v10 = vsel %vm663_vm5, %v665_v6, %v661_v8  ;;  %v676_v11 = vsel %vm675_vm6, %v1089_v58, %v672_v7 }
 0x2e8   :  { %v681_v12 = vsel %vm678_vm7, %v680_v9, %v676_v11  ;;  %683 = vst [vmem:[#allocation2] sm:$0xff] %v666_v10 }
 0x2e9   :  { %684 = vst [vmem:[#allocation2 + $0x8] sm:$0xff] %v681_v12 }
 0x2ea   :  { %698 = dma.vmem_to_hbm [thread:$0]  %s694_s14, 256, %s696_s23, [#allocation3]  }
 0x2eb   :  { %1186 = dma.done.wait [#allocation3], 256  }
 0x2ec   :  { %1187 = vsyncadd [#allocation3], 4294967040 }
 0x2ed   :  { %1188 = dma.done.wait [#allocation5], 256  }
 0x2ee   :  { %1189 = vsyncadd [#allocation5], 4294967040 }
 0x2ef   :  { %1190 = dma.done.wait [#allocation8], 128  }
 0x2f0   :  { %1191 = vsyncadd [#allocation8], 4294967168 }
 0x2f1   :  { %748 = vsyncpa [#allocation3], 1 }
 0x2f2   :  { %749 = vsyncpa [#allocation5], 1 }
 0x2f3   :  { %750 = vsyncpa [#allocation8], 1 }

</bundles_post_ra>
